<compile_context>
chip_gen: v5e
topology: v5e:2x2
jax: 0.10.0
libtpu: 0.0.40
codegen_flags: <defaults>
</compile_context>

<pallas_src>
import functools

import jax
import jax.numpy as jnp
from jax.experimental import pallas as pl
from jax.experimental.pallas import tpu as pltpu


def _leaky_relu_kernel(x_ref, o_ref, *, negative_slope):
    x = x_ref[...]
    slope = jnp.asarray(negative_slope, dtype=x.dtype)
    o_ref[...] = jnp.where(x >= 0, x, x * slope)


# Lane-dense width: multiple of 128 lanes (8 full vregs per sublane row).
_LANE_WIDTH = 1024
# Up to 512 rows x 1024 f32 = 2 MiB per tile buffer.
_MAX_BLOCK_ROWS = 512


def my_leaky_relu(x, negative_slope=0.01):
    """Pallas TPU implementation of MyLeakyReLU.forward (elementwise LeakyReLU)."""
    orig_shape = x.shape
    n = x.size
    if n == 0:
        # Degenerate input: nothing to compute.
        return x

    # Flatten and pad the tail so the fast axis is a large multiple of 128.
    x_flat = x.reshape(-1)
    pad = (-n) % _LANE_WIDTH
    if pad:
        x_flat = jnp.pad(x_flat, (0, pad))
    rows = x_flat.size // _LANE_WIDTH
    x2d = x_flat.reshape(rows, _LANE_WIDTH)

    # Tile rows.  If the slab is small, take it as a single full-extent block
    # (block_shape == array shape, so the (8,128) rule is satisfied).  Otherwise
    # use 512-row blocks (512 % 8 == 0); a partial last block is handled by
    # Pallas automatically.
    block_rows = rows if rows < _MAX_BLOCK_ROWS else _MAX_BLOCK_ROWS
    grid = (pl.cdiv(rows, block_rows),)

    kernel = functools.partial(_leaky_relu_kernel, negative_slope=negative_slope)

    out2d = pl.pallas_call(
        kernel,
        out_shape=jax.ShapeDtypeStruct((rows, _LANE_WIDTH), x.dtype),
        grid=grid,
        in_specs=[pl.BlockSpec((block_rows, _LANE_WIDTH), lambda i: (i, 0))],
        out_specs=pl.BlockSpec((block_rows, _LANE_WIDTH), lambda i: (i, 0)),
        compiler_params=pltpu.CompilerParams(
            # Row tiles are independent: shard across TCs on v7x megacore.
            dimension_semantics=("parallel",),
            # 2 MiB/tile * 2 buffers * (in+out) = 8 MiB << 32 MiB; explicit so
            # the tile choice is valid on every generation (v5e/v6e/v7x).
            vmem_limit_bytes=32 * 1024 * 1024,
        ),
    )(x2d)

    out_flat = out2d.reshape(-1)
    if pad:
        out_flat = out_flat[:n]
    return out_flat.reshape(orig_shape)


if __name__ == "__main__":
    key = jax.random.PRNGKey(0)
    # NCHW input, small shape consistent with an activation module.
    x = jax.random.normal(key, (2, 4, 16, 16), dtype=jnp.float32)

    out = my_leaky_relu(x, negative_slope=0.01)
    out = jax.block_until_ready(out)

    # Reference: plain-JAX semantics of the PyTorch forward
    #   clamp(x, min=0) + clamp(x, max=0) * slope
    ref = jnp.maximum(x, 0.0) + jnp.minimum(x, 0.0) * 0.01
    assert out.shape == x.shape and out.dtype == x.dtype
    assert jnp.allclose(out, ref, atol=1e-6), "mismatch vs reference"

    print("KERNEL_OK")
</pallas_src>

<mosaic_0001>
module attributes {stable_mosaic.version = 11 : i64} {
  func.func @_leaky_relu_kernel(%arg0: i32, %arg1: memref<2x1024xf32, #tpu.memory_space<vmem>>, %arg2: memref<2x1024xf32, #tpu.memory_space<vmem>>) attributes {dimension_semantics = [#tpu.dimension_semantics<parallel>], iteration_bounds = array<i64: 1>, scalar_prefetch = 0 : i64, scratch_operands = 0 : i64, tpu.core_type = #tpu.core_type<tc>, window_params = [{transform_indices = @transform_0, window_bounds = array<i64: 2, 1024>}, {transform_indices = @transform_1, window_bounds = array<i64: 2, 1024>}]} {
    %c0 = arith.constant 0 : index
    %c0_0 = arith.constant 0 : index
    %0 = vector.load %arg1[%c0, %c0_0] : memref<2x1024xf32, #tpu.memory_space<vmem>>, vector<2x1024xf32>
    %cst = arith.constant 0.000000e+00 : f32
    %1 = vector.broadcast %cst : f32 to vector<2x1024xf32>
    %2 = arith.cmpf oge, %0, %1 : vector<2x1024xf32>
    %cst_1 = arith.constant 0.00999999977 : f32
    %3 = vector.broadcast %cst_1 : f32 to vector<2x1024xf32>
    %4 = arith.mulf %0, %3 : vector<2x1024xf32>
    %5 = arith.select %2, %0, %4 : vector<2x1024xi1>, vector<2x1024xf32>
    %c0_2 = arith.constant 0 : index
    %c0_3 = arith.constant 0 : index
    %6 = vector.load %arg2[%c0_2, %c0_3] : memref<2x1024xf32, #tpu.memory_space<vmem>>, vector<2x1024xf32>
    tpu.vector_store %arg2[%c0_2, %c0_3], %5 {strides = array<i32>} : memref<2x1024xf32, #tpu.memory_space<vmem>>, vector<2x1024xf32>,
    return
  }
  func.func @transform_0(%arg0: i32) -> (i32, i32) {
    %c0_i32 = arith.constant 0 : i32
    %c0_i32_0 = arith.constant 0 : i32
    return %arg0, %c0_i32 : i32, i32
  }
  func.func @transform_1(%arg0: i32) -> (i32, i32) {
    %c0_i32 = arith.constant 0 : i32
    %c0_i32_0 = arith.constant 0 : i32
    return %arg0, %c0_i32 : i32, i32
  }
}

</mosaic_0001>

<bundles_post_ra>
// kernel: tpu_custom_call.1
= control target key start
LH: loop header
LB: loop body
LE: loop exit
PB: predicated region body
PF: predicated region fallthrough
CT: control target
= control target key end

     0   :  { %6 = vsyncpa [#allocation3], 0  ;;  %s122_s0 = inlined_call_operand.hbm [shape: f32[2,1024], index: 0, kind: input, shape index: {}]   ;;  %s123_s1 = inlined_call_operand.hbm [shape: f32[2,1024], index: 1, kind: output, shape index: {}]  }
   0x1   :  { %7 = vsyncpa [#allocation4], 0  ;;  %s13_s8 = sshll.u32 %s122_s0, 4  ;;  %s104_s9 = smov [#allocation2]   ;;  %s14_s8 = int_to_ptr.hbm [resolvable:$true] %s13_s8 }
   0x2   :  { %s15_s10 = sshll.u32 %s104_s9, 4  ;;  %s16_s10 = int_to_ptr.vmem [resolvable:$true] %s15_s10 }
   0x3   :  { %18 = dma.hbm_to_vmem [thread:$0]  %s14_s8, 256, %s16_s10, [#allocation3]  }
   0x4   :  { %100 = dma.done.wait [#allocation3], 256  }
   0x5   :  { %101 = vsyncadd [#allocation3], 4294967040  ;;  %v23_v0 = vld [vmem:[#allocation2] sm:$0xff]  ;;  %v24_v1 = vld [vmem:[#allocation2 + $0x8] sm:$0xff]  ;;  %s105_s11 = smov [#allocation5]   ;;  %s40_s15 = sshll.u32 %s123_s1, 4  ;;  %s41_s15 = int_to_ptr.hbm [resolvable:$true] %s40_s15 }
   0x6   :  { %s38_s12 = sshll.u32 %s105_s11, 4  ;;  %vm25_vm0 = vcmp.ge.f32.partialorder %v23_v0, 0.0  ;;  %v27_v2 = vmul.f32 0.01, %v23_v0  ;;  %vm26_vm1 = vcmp.ge.f32.partialorder %v24_v1, 0.0  ;;  %s39_s12 = int_to_ptr.vmem [resolvable:$true] %s38_s12 }
   0x7   :  { %v28_v3 = vmul.f32 0.01, %v24_v1 }
   0x8   :  { %v29_v4 = vsel %vm25_vm0, %v23_v0, %v27_v2 }
   0x9   :  { %v30_v5 = vsel %vm26_vm1, %v24_v1, %v28_v3  ;;  %31 = vst [vmem:[#allocation5] sm:$0xff] %v29_v4 }
   0xa   :  { %32 = vst [vmem:[#allocation5 + $0x8] sm:$0xff] %v30_v5 }
   0xb   :  { %43 = dma.vmem_to_hbm [thread:$0]  %s39_s12, 256, %s41_s15, [#allocation4]  }
   0xc   :  { %102 = dma.done.wait [#allocation4], 256  }
   0xd   :  { %103 = vsyncadd [#allocation4], 4294967040 }
   0xe   :  { %48 = vsyncpa [#allocation3], 1 }
   0xf   :  { %49 = vsyncpa [#allocation4], 1 }

</bundles_post_ra>
